<compile_context>
chip_gen: v5e
topology: v5e:2x2
jax: 0.10.0
libtpu: 0.0.40
codegen_flags: <defaults>
</compile_context>

<pallas_src>
import math

import jax
import jax.numpy as jnp
from jax.experimental import pallas as pl
from jax.experimental.pallas import tpu as pltpu

_LANE = 128
_MAX_BLOCK_BYTES = 4 << 20        # 4 MiB/block -> 2 arrays x 2 buffers = 16 MiB VMEM
_VMEM_LIMIT_BYTES = 32 << 20      # explicit scoped-VMEM limit (safe on v5e/v6e/v7x)


def _reshape_kernel(x_ref, o_ref):
    # Pure 2-D block copy; the flatten already happened (for free) in the wrapper.
    o_ref[...] = x_ref[...]


def _sublane_multiple(itemsize: int) -> int:
    # Sub-32-bit dtypes pack along sublanes: 8 for f32, 16 for bf16, 32 for int8.
    return max(8, 32 // max(1, itemsize))


def _carve_flat(total: int, itemsize: int, sub: int):
    """Pick (R, K) with R*K == total, K % 128 == 0, preferring >= `sub` rows and
    a full-width row block that fits the per-block byte budget."""
    q = total // _LANE                      # caller guarantees total % 128 == 0
    divs = set()
    d = 1
    while d * d <= q:
        if q % d == 0:
            divs.add(d)
            divs.add(q // d)
        d += 1
    max_k = max(_LANE, (_MAX_BLOCK_BYTES // (sub * itemsize)) // _LANE * _LANE)
    cands = [_LANE * d for d in divs]
    good = [k for k in cands if k <= max_k and total // k >= sub]
    if good:
        K = max(good)                       # widest row that still fills sublanes
    else:
        fit = [k for k in cands if k <= max_k]
        K = min(fit) if fit else _LANE      # tiny total: maximize row count
    return total // K, K


def _pick_tiles(R: int, K: int, itemsize: int, sub: int):
    """Pick (tb, tk): prefer full-width rows (contiguous DMA), dtype-aware sublanes."""
    if K % _LANE != 0:
        tk = K                                              # full lane dim (always legal)
    else:
        max_k = max(_LANE, (_MAX_BLOCK_BYTES // (sub * itemsize)) // _LANE * _LANE)
        tk = K if K <= max_k else max_k                     # full row width when it fits
    max_tb = max(1, _MAX_BLOCK_BYTES // (tk * itemsize))
    if R <= max_tb:
        tb = R                                              # full sublane dim (always legal)
    else:
        tb = max(sub, (max_tb // sub) * sub)                # dtype-aware sublane multiple
    return tb, tk


def _pallas_flatten_copy(x: jax.Array, B: int, F: int) -> jax.Array:
    itemsize = jnp.dtype(x.dtype).itemsize
    sub = _sublane_multiple(itemsize)
    total = B * F

    # Choose the 2-D carve of the (bit-identical) contiguous buffer.
    if B >= sub and F % _LANE == 0:
        R, K = B, F
    elif total % _LANE == 0:
        R, K = _carve_flat(total, itemsize, sub)
    else:
        # Awkward total: fall back to full-dim blocks (may use masked stores).
        R, K = B, F

    x2d = jnp.reshape(x, (R, K))            # metadata-only view of the same buffer

    tb, tk = _pick_tiles(R, K, itemsize, sub)
    grid_r = pl.cdiv(R, tb)
    grid_k = pl.cdiv(K, tk)

    # Give v7x's two TensorCores something to split when the grid collapsed.
    if grid_r == 1 and grid_k == 1 and R >= 2 * sub and R % (2 * sub) == 0:
        tb = R // 2
        grid_r = 2

    out2d = pl.pallas_call(
        _reshape_kernel,
        out_shape=jax.ShapeDtypeStruct((R, K), x.dtype),
        grid_spec=pltpu.PrefetchScalarGridSpec(
            num_scalar_prefetch=0,
            grid=(grid_r, grid_k),
            in_specs=[pl.BlockSpec((tb, tk), lambda i, j: (i, j))],
            out_specs=pl.BlockSpec((tb, tk), lambda i, j: (i, j)),
        ),
        compiler_params=pltpu.CompilerParams(
            dimension_semantics=("parallel", "parallel"),
            vmem_limit_bytes=_VMEM_LIMIT_BYTES,
        ),
        cost_estimate=pl.CostEstimate(
            flops=0,
            transcendentals=0,
            bytes_accessed=2 * total * itemsize,
        ),
    )(x2d)

    return jnp.reshape(out2d, (B, F))       # metadata-only


def reshape_flatten(x: jax.Array, *, force_pallas_copy: bool = False) -> jax.Array:
    """Equivalent of `xs.reshape((xs.shape[0], -1))`.

    Default path is a metadata-only jnp.reshape (zero HBM traffic), per the
    performance review.  Set `force_pallas_copy=True` to run the explicit
    Pallas copy kernel (fusion anchor / forced materialization).
    """
    B = x.shape[0]
    F = math.prod(x.shape[1:]) if len(x.shape) > 1 else 1
    if not force_pallas_copy:
        return jnp.reshape(x, (B, F))
    return _pallas_flatten_copy(x, B, F)


if __name__ == "__main__":
    key = jax.random.PRNGKey(0)

    # Small VGG-style feature map: (B, C, H, W) with a tiny batch (exercises
    # the flat-slab carve: B=2 < 8 sublanes).
    x = jax.random.normal(key, (2, 4, 16, 16), dtype=jnp.float32)
    ref = x.reshape((x.shape[0], -1))

    # Recommended hot path: metadata-only reshape, no kernel, no HBM traffic.
    fast = jax.block_until_ready(reshape_flatten(x))
    assert fast.shape == ref.shape and fast.dtype == ref.dtype
    assert bool(jnp.array_equal(fast, ref))

    # Explicit Pallas copy path.
    out = jax.block_until_ready(reshape_flatten(x, force_pallas_copy=True))
    assert out.shape == ref.shape and out.dtype == ref.dtype
    assert bool(jnp.array_equal(out, ref))

    # A second case exercising the direct (B, F) path and bf16 sublane packing.
    x2 = jax.random.normal(jax.random.PRNGKey(1), (16, 4, 8, 16)).astype(jnp.bfloat16)
    ref2 = x2.reshape((x2.shape[0], -1))
    out2 = jax.block_until_ready(reshape_flatten(x2, force_pallas_copy=True))
    assert out2.shape == ref2.shape and out2.dtype == ref2.dtype
    assert bool(jnp.array_equal(out2, ref2))

    print("KERNEL_OK")
</pallas_src>

<mosaic_0001>
module attributes {stable_mosaic.version = 11 : i64} {
  func.func @_reshape_kernel(%arg0: i32, %arg1: i32, %arg2: memref<8x256xf32, #tpu.memory_space<vmem>>, %arg3: memref<8x256xf32, #tpu.memory_space<vmem>>) attributes {dimension_semantics = [#tpu.dimension_semantics<parallel>, #tpu.dimension_semantics<parallel>], iteration_bounds = array<i64: 1, 1>, scalar_prefetch = 0 : i64, scratch_operands = 0 : i64, tpu.core_type = #tpu.core_type<tc>, window_params = [{transform_indices = @transform_0, window_bounds = array<i64: 8, 256>}, {transform_indices = @transform_1, window_bounds = array<i64: 8, 256>}]} {
    %c0 = arith.constant 0 : index
    %c0_0 = arith.constant 0 : index
    %0 = vector.load %arg2[%c0, %c0_0] : memref<8x256xf32, #tpu.memory_space<vmem>>, vector<8x256xf32>
    %c0_1 = arith.constant 0 : index
    %c0_2 = arith.constant 0 : index
    %1 = vector.load %arg3[%c0_1, %c0_2] : memref<8x256xf32, #tpu.memory_space<vmem>>, vector<8x256xf32>
    tpu.vector_store %arg3[%c0_1, %c0_2], %0 {strides = array<i32>} : memref<8x256xf32, #tpu.memory_space<vmem>>, vector<8x256xf32>,
    return
  }
  func.func @transform_0(%arg0: i32, %arg1: i32) -> (i32, i32) {
    %c0_i32 = arith.constant 0 : i32
    return %arg0, %arg1 : i32, i32
  }
  func.func @transform_1(%arg0: i32, %arg1: i32) -> (i32, i32) {
    %c0_i32 = arith.constant 0 : i32
    return %arg0, %arg1 : i32, i32
  }
}

</mosaic_0001>

<bundles_post_ra>
// kernel: tpu_custom_call.1
= control target key start
LH: loop header
LB: loop body
LE: loop exit
PB: predicated region body
PF: predicated region fallthrough
CT: control target
= control target key end

     0   :  { %6 = vsyncpa [#allocation3], 0  ;;  %s116_s0 = inlined_call_operand.hbm [shape: f32[8,256], index: 0, kind: input, shape index: {}]   ;;  %s117_s1 = inlined_call_operand.hbm [shape: f32[8,256], index: 1, kind: output, shape index: {}]  }
   0x1   :  { %7 = vsyncpa [#allocation4], 0  ;;  %s13_s8 = sshll.u32 %s116_s0, 4  ;;  %s98_s9 = smov [#allocation2]   ;;  %s14_s8 = int_to_ptr.hbm [resolvable:$true] %s13_s8 }
   0x2   :  { %s15_s10 = sshll.u32 %s98_s9, 4  ;;  %s16_s10 = int_to_ptr.vmem [resolvable:$true] %s15_s10 }
   0x3   :  { %18 = dma.hbm_to_vmem [thread:$0]  %s14_s8, 256, %s16_s10, [#allocation3]  }
   0x4   :  { %94 = dma.done.wait [#allocation3], 256  }
   0x5   :  { %95 = vsyncadd [#allocation3], 4294967040  ;;  %s99_s11 = smov [#allocation5]   ;;  %s34_s15 = sshll.u32 %s117_s1, 4  ;;  %v23_v0 = vld [vmem:[#allocation2] sm:$0xff]  ;;  %v24_v1 = vld [vmem:[#allocation2 + $0x8] sm:$0xff]  ;;  %s35_s15 = int_to_ptr.hbm [resolvable:$true] %s34_s15 }
   0x6   :  { %s32_s12 = sshll.u32 %s99_s11, 4  ;;  %25 = vst [vmem:[#allocation5] sm:$0xff] %v23_v0  ;;  %s33_s12 = int_to_ptr.vmem [resolvable:$true] %s32_s12 }
   0x7   :  { %26 = vst [vmem:[#allocation5 + $0x8] sm:$0xff] %v24_v1 }
   0x8   :  { %37 = dma.vmem_to_hbm [thread:$0]  %s33_s12, 256, %s35_s15, [#allocation4]  }
   0x9   :  { %96 = dma.done.wait [#allocation4], 256  }
   0xa   :  { %97 = vsyncadd [#allocation4], 4294967040 }
   0xb   :  { %42 = vsyncpa [#allocation3], 1 }
   0xc   :  { %43 = vsyncpa [#allocation4], 1 }

</bundles_post_ra>
